<compile_context>
chip_gen: v6e
topology: v6e:2x2x1
jax: 0.10.0
libtpu: 0.0.40
codegen_flags: <defaults>
</compile_context>

<pallas_src>
import functools
import math

import jax
import jax.numpy as jnp
from jax import lax
from jax.experimental import pallas as pl
from jax.experimental.pallas import tpu as pltpu

# Compatibility: newer jax uses pltpu.CompilerParams, older pltpu.TPUCompilerParams.
_CompilerParams = getattr(pltpu, "CompilerParams", None) or getattr(
    pltpu, "TPUCompilerParams"
)


# ----------------------------------------------------------------------------
# Pallas kernels
# ----------------------------------------------------------------------------
def _full_spec(shape):
    return pl.BlockSpec(shape, lambda i, _s=len(shape): (0,) * _s)


def heads_mlp(x, w1_all, b1_all, w2_bd, b2_all):
    """All curvature heads in one kernel:
    sigmoid(relu(x @ W1_all + b1_all) @ W2_blockdiag + b2_all) : (N, 1+H)."""
    N, F_in = x.shape
    Hdim = w1_all.shape[1]
    n_heads = w2_bd.shape[1]

    def kernel(x_ref, w1_ref, b1_ref, w2_ref, b2_ref, o_ref):
        h = jnp.dot(x_ref[...], w1_ref[...], preferred_element_type=jnp.float32)
        h = jnp.maximum(h + b1_ref[...], 0.0)
        y = jnp.dot(h, w2_ref[...], preferred_element_type=jnp.float32) + b2_ref[...]
        o_ref[...] = jax.nn.sigmoid(y)

    return pl.pallas_call(
        kernel,
        out_shape=jax.ShapeDtypeStruct((N, n_heads), jnp.float32),
        grid=(1,),
        in_specs=[
            _full_spec((N, F_in)),
            _full_spec((F_in, Hdim)),
            _full_spec((1, Hdim)),
            _full_spec((Hdim, n_heads)),
            _full_spec((1, n_heads)),
        ],
        out_specs=_full_spec((N, n_heads)),
    )(x, w1_all, b1_all.reshape(1, Hdim), w2_bd, b2_all.reshape(1, n_heads))


def weight_mlp(params, n_edges):
    """WeightMLP(ones(E)) fused into one kernel; output is a lane-major (1, E)."""
    w1, b1 = params["w1"], params["b1"]
    w2, b2 = params["w2"], params["b2"]
    w3, b3 = params["w3"], params["b3"]
    H1, H2 = w1.shape[1], w2.shape[1]
    E = n_edges

    def kernel(w1_ref, b1_ref, w2_ref, b2_ref, w3_ref, b3_ref, o_ref):
        # ones(1, E) @ W1  ==  column sums of W1
        h = jnp.sum(w1_ref[...], axis=0, keepdims=True) + b1_ref[...]
        h = jnp.maximum(h, 0.0)
        h = jnp.dot(h, w2_ref[...], preferred_element_type=jnp.float32) + b2_ref[...]
        h = jnp.maximum(h, 0.0)
        y = jnp.dot(h, w3_ref[...], preferred_element_type=jnp.float32) + b3_ref[...]
        o_ref[...] = jax.nn.sigmoid(y)

    return pl.pallas_call(
        kernel,
        out_shape=jax.ShapeDtypeStruct((1, E), jnp.float32),
        grid=(1,),
        in_specs=[
            _full_spec((E, H1)),
            _full_spec((1, H1)),
            _full_spec((H1, H2)),
            _full_spec((1, H2)),
            _full_spec((H2, E)),
            _full_spec((1, E)),
        ],
        out_specs=_full_spec((1, E)),
    )(w1, b1.reshape(1, H1), w2, b2.reshape(1, H2), w3, b3.reshape(1, E))


def gamma_curv_loss(fT, kappa, w_row, Gs, Gd):
    """compute_gamma + compute_gamma2_optimized + compute_loss for ALL heads.

    fT:(H,N) f32 (heads on sublanes, nodes on lanes), kappa:(N,1) f32,
    w_row:(1,E) f32, Gs,Gd:(E,N) bf16 one-hot of src/dst.
    Returns the summed curvature loss as (1,1).
    """
    Hh, N = fT.shape
    E = Gs.shape[0]

    def kernel(f_ref, k_ref, w_ref, gs_ref, gd_ref, loss_ref):
        dot = functools.partial(jnp.dot, preferred_element_type=jnp.float32)
        fT_ = f_ref[...]                            # (H, N)
        kappa_ = k_ref[...]                         # (N, 1)
        w = w_ref[...]                              # (1, E)
        Gs_ = gs_ref[...].astype(jnp.float32)       # bf16 0/1 -> f32 (exact)
        Gd_ = gd_ref[...].astype(jnp.float32)

        nt = (((1,), (1,)), ((), ()))               # contract node axis of both

        def edge_diff(node_t):                      # (H,N) -> (H,E): v[dst]-v[src]
            at_dst = lax.dot_general(node_t, Gd_, nt,
                                     preferred_element_type=jnp.float32)
            at_src = lax.dot_general(node_t, Gs_, nt,
                                     preferred_element_type=jnp.float32)
            return at_dst - at_src

        def scatter_src(edge_t):                    # (H,E) -> (H,N): add onto src
            return dot(edge_t, Gs_)

        fd = edge_diff(fT_)                         # f[dst]-f[src]        (H,E)
        wfd = w * fd
        delta_f = scatter_src(wfd)                  # (H,N)
        gamma = 0.5 * scatter_src(wfd * fd)         # compute_gamma        (H,N)
        gd = edge_diff(gamma)
        delta_gamma = scatter_src(w * gd)
        dfd = edge_diff(delta_f)
        gamma_f_delta = 0.5 * scatter_src(wfd * dfd)
        gamma2 = 0.5 * delta_gamma - gamma_f_delta  # compute_gamma2       (H,N)

        # compute_loss (torch (N,1)*(N,) -> (N,N) broadcast reproduced exactly);
        # kappa.sum() hoisted out of the per-head loop.
        ksum = jnp.sum(kappa_, keepdims=True)       # (1,1)
        acc = jnp.zeros((1, 1), jnp.float32)
        for h in range(Hh):                         # static, small
            diff = kappa_ * gamma[h:h + 1, :] - gamma2[h:h + 1, :]   # (N,N)
            acc = acc + jnp.sum(jnp.maximum(diff, 0.0), keepdims=True)
        loss_ref[...] = acc - jnp.float32(Hh) * ksum

    return pl.pallas_call(
        kernel,
        out_shape=jax.ShapeDtypeStruct((1, 1), jnp.float32),
        grid=(1,),
        in_specs=[
            _full_spec((Hh, N)),
            _full_spec((N, 1)),
            _full_spec((1, E)),
            _full_spec((E, N)),
            _full_spec((E, N)),
        ],
        out_specs=_full_spec((1, 1)),
    )(fT, kappa, w_row, Gs, Gd)


def gcn_layer(ahat, x, w, b, mode):
    """One GCNConv layer, tiled over output row blocks ("parallel" grid axis):
    mode=='relu'          -> relu(A_hat @ X @ W + b)            : (N, F_out)
    mode=='sigmoid_mean'  -> sigmoid(A_hat @ X @ W + b).mean(1) : (N, 1)
    Matmul association is chosen per layer: (A@X)@W if F_in <= F_out else A@(X@W).
    """
    N = ahat.shape[0]
    F_in, F_out = x.shape[1], w.shape[1]
    out_cols = F_out if mode == "relu" else 1
    ax_first = F_in <= F_out
    tm = N if N <= 256 else 256
    assert N % tm == 0, "row tiling expects N <= 256 or N % 256 == 0"
    grid = (N // tm,)

    def kernel(a_ref, x_ref, w_ref, b_ref, o_ref):
        if ax_first:
            ax = jnp.dot(a_ref[...], x_ref[...], preferred_element_type=jnp.float32)
            y = jnp.dot(ax, w_ref[...], preferred_element_type=jnp.float32) + b_ref[...]
        else:
            xw = jnp.dot(x_ref[...], w_ref[...], preferred_element_type=jnp.float32)
            y = jnp.dot(a_ref[...], xw, preferred_element_type=jnp.float32) + b_ref[...]
        if mode == "relu":
            o_ref[...] = jnp.maximum(y, 0.0)
        else:
            o_ref[...] = jnp.mean(jax.nn.sigmoid(y), axis=1, keepdims=True)

    return pl.pallas_call(
        kernel,
        out_shape=jax.ShapeDtypeStruct((N, out_cols), jnp.float32),
        grid=grid,
        in_specs=[
            pl.BlockSpec((tm, N), lambda i: (i, 0)),
            pl.BlockSpec((N, F_in), lambda i: (0, 0)),
            pl.BlockSpec((F_in, F_out), lambda i: (0, 0)),
            pl.BlockSpec((1, F_out), lambda i: (0, 0)),
        ],
        out_specs=pl.BlockSpec((tm, out_cols), lambda i: (i, 0)),
        compiler_params=_CompilerParams(dimension_semantics=("parallel",)),
    )(ahat, x, w, b.reshape(1, F_out))


# ----------------------------------------------------------------------------
# Plain-JAX glue
# ----------------------------------------------------------------------------
def gcn_norm_dense(src, dst, keep_edge, n):
    """Dense D^{-1/2}(A+I)D^{-1/2} matching PyG gcn_norm (add self loops)."""
    A = jnp.zeros((n, n), jnp.float32).at[dst, src].add(keep_edge)
    A = A * (1.0 - jnp.eye(n, dtype=jnp.float32))      # drop existing self loops
    A = A + jnp.eye(n, dtype=jnp.float32)              # add self loops (weight 1)
    deg = jnp.sum(A, axis=1)
    dinv = jnp.where(deg > 0, jax.lax.rsqrt(deg), 0.0)
    return dinv[:, None] * A * dinv[None, :]


def _linear_init(key, fan_in, shape):
    bound = 1.0 / math.sqrt(fan_in)
    return jax.random.uniform(key, shape, jnp.float32, -bound, bound)


def init_params(key, in_ch, hid_ch, out_ch, num_layers, n_edges, fn_count=3):
    keys = iter(jax.random.split(key, 64))

    def mlp2(din, dhid, dout):
        return {
            "w1": _linear_init(next(keys), din, (din, dhid)),
            "b1": _linear_init(next(keys), din, (dhid,)),
            "w2": _linear_init(next(keys), dhid, (dhid, dout)),
            "b2": _linear_init(next(keys), dhid, (dout,)),
        }

    params = {
        "curv": mlp2(in_ch, 20, 1),
        "fn_mlps": [mlp2(in_ch, 20, 1) for _ in range(fn_count)],
        "weight_mlp": {
            "w1": _linear_init(next(keys), n_edges, (n_edges, 64)),
            "b1": _linear_init(next(keys), n_edges, (64,)),
            "w2": _linear_init(next(keys), 64, (64, 64)),
            "b2": _linear_init(next(keys), 64, (64,)),
            "w3": _linear_init(next(keys), 64, (64, n_edges)),
            "b3": _linear_init(next(keys), 64, (n_edges,)),
        },
        "gcn": [],
    }
    for i in range(num_layers):
        din = in_ch if i == 0 else hid_ch
        dout = out_ch if i == num_layers - 1 else hid_ch
        params["gcn"].append(
            {
                "w": _linear_init(next(keys), din, (din, dout)),
                "b": jnp.zeros((dout,), jnp.float32),
            }
        )
    return params


def dc_gcn_forward(params, x, edge_index, *, p=10, num_layers=2):
    N = x.shape[0]
    E = edge_index.shape[1]
    src, dst = edge_index[0], edge_index[1]
    H = len(params["fn_mlps"])
    hid = params["curv"]["w1"].shape[1]          # 20
    n_heads = 1 + H

    # --- batched curvature + fn-head MLPs: one wide matmul + block-diag W2 ---
    head_list = [params["curv"]] + list(params["fn_mlps"])
    w1_all = jnp.concatenate([hp["w1"] for hp in head_list], axis=1)   # (F_in, n_heads*hid)
    b1_all = jnp.concatenate([hp["b1"] for hp in head_list], axis=0)   # (n_heads*hid,)
    w2_bd = jnp.zeros((n_heads * hid, n_heads), jnp.float32)
    for i, hp in enumerate(head_list):
        w2_bd = w2_bd.at[i * hid:(i + 1) * hid, i].set(hp["w2"][:, 0])
    b2_all = jnp.concatenate([hp["b2"] for hp in head_list], axis=0)   # (n_heads,)

    head_out = heads_mlp(x, w1_all, b1_all, w2_bd, b2_all)             # (N, 1+H)
    kappa = head_out[:, :1]                                            # (N, 1)
    fT = head_out[:, 1:].T                                             # (H, N) lane-major

    # --- edge weights = WeightMLP(ones(E)) : lane-major (1, E) ---
    w_row = weight_mlp(params["weight_mlp"], E)

    # --- dense one-hot edge operators in bf16 (0/1 exact), used on the MXU ---
    Gs = jax.nn.one_hot(src, N, dtype=jnp.bfloat16)                    # (E, N)
    Gd = jax.nn.one_hot(dst, N, dtype=jnp.bfloat16)                    # (E, N)

    # --- curvature loss over all heads, one fused kernel ---
    curv_loss = gamma_curv_loss(fT, kappa, w_row, Gs, Gd)[0, 0]

    # --- GCN layers with cumulative top-k curvature vertex removal ---
    kappa_flat = head_out[:, 0]
    keep_cum = jnp.ones((N,), jnp.float32)
    h = x
    out = None
    for li in range(num_layers):
        m = int(N * (p * li) / 100)
        if m > 0:
            _, idx = jax.lax.top_k(kappa_flat, m)
            keep = jnp.ones((N,), jnp.float32).at[idx].set(0.0)
            keep_cum = keep_cum * keep
        keep_edge = keep_cum[src] * keep_cum[dst]
        ahat = gcn_norm_dense(src, dst, keep_edge, N)
        gp = params["gcn"][li]
        if li < num_layers - 1:
            h = gcn_layer(ahat, h, gp["w"], gp["b"], "relu")
            # dropout: eval mode -> identity
        else:
            out = gcn_layer(ahat, h, gp["w"], gp["b"], "sigmoid_mean")   # (N, 1)
    return out, curv_loss


# ----------------------------------------------------------------------------
# Example run
# ----------------------------------------------------------------------------
if __name__ == "__main__":
    N, IN_CH, HID_CH, OUT_CH = 16, 8, 16, 4
    NUM_LAYERS, FN_COUNT, E, P = 2, 3, 40, 10

    key = jax.random.PRNGKey(0)
    kx, ks, ko, kp = jax.random.split(key, 4)

    x = jax.random.normal(kx, (N, IN_CH), dtype=jnp.float32)
    src = jax.random.randint(ks, (E,), 0, N)
    off = jax.random.randint(ko, (E,), 1, N)
    dst = (src + off) % N                       # no self loops
    edge_index = jnp.stack([src, dst]).astype(jnp.int32)

    params = init_params(kp, IN_CH, HID_CH, OUT_CH, NUM_LAYERS, E, FN_COUNT)

    out, curv_loss = dc_gcn_forward(
        params, x, edge_index, p=P, num_layers=NUM_LAYERS
    )
    out = jax.block_until_ready(out)
    curv_loss = jax.block_until_ready(curv_loss)

    assert out.shape == (N, 1)
    assert curv_loss.shape == ()
    assert bool(jnp.all(jnp.isfinite(out))) and bool(jnp.isfinite(curv_loss))
    print("KERNEL_OK")
</pallas_src>

<mosaic_0001>
module attributes {stable_mosaic.version = 11 : i64} {
  func.func @kernel(%arg0: i32, %arg1: memref<16x8xf32, #tpu.memory_space<vmem>>, %arg2: memref<8x80xf32, #tpu.memory_space<vmem>>, %arg3: memref<1x80xf32, #tpu.memory_space<vmem>>, %arg4: memref<80x4xf32, #tpu.memory_space<vmem>>, %arg5: memref<1x4xf32, #tpu.memory_space<vmem>>, %arg6: memref<16x4xf32, #tpu.memory_space<vmem>>) attributes {dimension_semantics = [#tpu.dimension_semantics<arbitrary>], iteration_bounds = array<i64: 1>, scalar_prefetch = 0 : i64, scratch_operands = 0 : i64, tpu.core_type = #tpu.core_type<tc>, window_params = [{pipeline_mode = #tpu.pipeline_mode<synchronous>, transform_indices = @transform_0, window_bounds = array<i64: 16, 8>}, {pipeline_mode = #tpu.pipeline_mode<synchronous>, transform_indices = @transform_1, window_bounds = array<i64: 8, 80>}, {pipeline_mode = #tpu.pipeline_mode<synchronous>, transform_indices = @transform_2, window_bounds = array<i64: 1, 80>}, {pipeline_mode = #tpu.pipeline_mode<synchronous>, transform_indices = @transform_3, window_bounds = array<i64: 80, 4>}, {pipeline_mode = #tpu.pipeline_mode<synchronous>, transform_indices = @transform_4, window_bounds = array<i64: 1, 4>}, {pipeline_mode = #tpu.pipeline_mode<synchronous>, transform_indices = @transform_5, window_bounds = array<i64: 16, 4>}]} {
    %c0 = arith.constant 0 : index
    %c0_0 = arith.constant 0 : index
    %0 = vector.load %arg1[%c0, %c0_0] : memref<16x8xf32, #tpu.memory_space<vmem>>, vector<16x8xf32>
    %c0_1 = arith.constant 0 : index
    %c0_2 = arith.constant 0 : index
    %1 = vector.load %arg2[%c0_1, %c0_2] : memref<8x80xf32, #tpu.memory_space<vmem>>, vector<8x80xf32>
    %cst = arith.constant dense<0.000000e+00> : vector<16x80xf32>
    %2 = tpu.matmul %0, %1, %cst {dimension_numbers = #tpu.dot_dimension_numbers<[1], [0], [0], [1], [0, 0, 1, 1], [], []>} : vector<16x8xf32>, vector<8x80xf32>, vector<16x80xf32> -> vector<16x80xf32>
    %c0_3 = arith.constant 0 : index
    %c0_4 = arith.constant 0 : index
    %3 = vector.load %arg3[%c0_3, %c0_4] : memref<1x80xf32, #tpu.memory_space<vmem>>, vector<1x80xf32>
    %4 = vector.broadcast %3 : vector<1x80xf32> to vector<16x80xf32>
    %5 = arith.addf %2, %4 : vector<16x80xf32>
    %cst_5 = arith.constant 0.000000e+00 : f32
    %6 = vector.broadcast %cst_5 : f32 to vector<16x80xf32>
    %7 = arith.maximumf %5, %6 : vector<16x80xf32>
    %c0_6 = arith.constant 0 : index
    %c0_7 = arith.constant 0 : index
    %8 = vector.load %arg4[%c0_6, %c0_7] : memref<80x4xf32, #tpu.memory_space<vmem>>, vector<80x4xf32>
    %cst_8 = arith.constant dense<0.000000e+00> : vector<16x4xf32>
    %9 = tpu.matmul %7, %8, %cst_8 {dimension_numbers = #tpu.dot_dimension_numbers<[1], [0], [0], [1], [0, 0, 1, 1], [], []>} : vector<16x80xf32>, vector<80x4xf32>, vector<16x4xf32> -> vector<16x4xf32>
    %c0_9 = arith.constant 0 : index
    %c0_10 = arith.constant 0 : index
    %10 = vector.load %arg5[%c0_9, %c0_10] : memref<1x4xf32, #tpu.memory_space<vmem>>, vector<1x4xf32>
    %11 = vector.broadcast %10 : vector<1x4xf32> to vector<16x4xf32>
    %12 = arith.addf %9, %11 : vector<16x4xf32>
    %13 = arith.negf %12 : vector<16x4xf32>
    %14 = math.exp %13 : vector<16x4xf32>
    %cst_11 = arith.constant 1.000000e+00 : f32
    %15 = vector.broadcast %cst_11 : f32 to vector<16x4xf32>
    %16 = arith.addf %15, %14 : vector<16x4xf32>
    %17 = arith.divf %15, %16 : vector<16x4xf32>
    %c0_12 = arith.constant 0 : index
    %c0_13 = arith.constant 0 : index
    %18 = vector.load %arg6[%c0_12, %c0_13] : memref<16x4xf32, #tpu.memory_space<vmem>>, vector<16x4xf32>
    tpu.vector_store %arg6[%c0_12, %c0_13], %17 {strides = array<i32>} : memref<16x4xf32, #tpu.memory_space<vmem>>, vector<16x4xf32>,
    return
  }
  func.func @transform_0(%arg0: i32) -> (i32, i32) {
    %c0_i32 = arith.constant 0 : i32
    %c0_i32_0 = arith.constant 0 : i32
    %c0_i32_1 = arith.constant 0 : i32
    return %c0_i32, %c0_i32_0 : i32, i32
  }
  func.func @transform_1(%arg0: i32) -> (i32, i32) {
    %c0_i32 = arith.constant 0 : i32
    %c0_i32_0 = arith.constant 0 : i32
    %c0_i32_1 = arith.constant 0 : i32
    return %c0_i32, %c0_i32_0 : i32, i32
  }
  func.func @transform_2(%arg0: i32) -> (i32, i32) {
    %c0_i32 = arith.constant 0 : i32
    %c0_i32_0 = arith.constant 0 : i32
    %c0_i32_1 = arith.constant 0 : i32
    return %c0_i32, %c0_i32_0 : i32, i32
  }
  func.func @transform_3(%arg0: i32) -> (i32, i32) {
    %c0_i32 = arith.constant 0 : i32
    %c0_i32_0 = arith.constant 0 : i32
    %c0_i32_1 = arith.constant 0 : i32
    return %c0_i32, %c0_i32_0 : i32, i32
  }
  func.func @transform_4(%arg0: i32) -> (i32, i32) {
    %c0_i32 = arith.constant 0 : i32
    %c0_i32_0 = arith.constant 0 : i32
    %c0_i32_1 = arith.constant 0 : i32
    return %c0_i32, %c0_i32_0 : i32, i32
  }
  func.func @transform_5(%arg0: i32) -> (i32, i32) {
    %c0_i32 = arith.constant 0 : i32
    %c0_i32_0 = arith.constant 0 : i32
    %c0_i32_1 = arith.constant 0 : i32
    return %c0_i32, %c0_i32_0 : i32, i32
  }
}

</mosaic_0001>

<bundles_post_ra>
// kernel: tpu_custom_call.1
= control target key start
LH: loop header
LB: loop body
LE: loop exit
PB: predicated region body
PF: predicated region fallthrough
CT: control target
= control target key end

     0   :  { %vm30_vm0 = vcmask 64512   ;;  %vm131_vm1 = vcmask 654336   ;;  %vm225_vm2 = vcmask 31744   ;;  %s372_s1 = inlined_call_operand.vmem [shape: f32[8,80], index: 1, kind: input, shape index: {}]   ;;  %s373_s0 = inlined_call_operand.vmem [shape: f32[16,8], index: 0, kind: input, shape index: {}]   ;;  %s374_s3 = inlined_call_operand.vmem [shape: f32[80,4], index: 3, kind: input, shape index: {}]   ;;  %s375_s2 = inlined_call_operand.vmem [shape: f32[1,80], index: 2, kind: input, shape index: {}]   ;;  %s376_s4 = inlined_call_operand.vmem [shape: f32[1,4], index: 4, kind: input, shape index: {}]   ;;  %s377_s5 = inlined_call_operand.vmem [shape: f32[16,4], index: 5, kind: output, shape index: {}]  }
   0x1   :  { %v22_v0 = vld [vmem:[%s372_s1] sm:$0xff]  ;;  %v21_v2 = vld [vmem:[%s373_s0 + $0x8] sm:$0xff]  ;;  %v121_v5 = vld [vmem:[%s374_s3 + $0x38] sm:$0xff] }
   0x2   :  { %v20_v1 = vld [vmem:[%s373_s0] sm:$0xff]  ;;  %255 = vmatprep.subr.mxu0 %v22_v0  ;;  %v123_v3 = vld [vmem:[%s374_s3 + $0x48] sm:$0xff]  ;;  %v120_v6 = vld [vmem:[%s374_s3 + $0x30] sm:$0xff] }
   0x3   :  { %257 = vmatprep.mubr.msk.f32.mxu0 %vm30_vm0, %v20_v1  ;;  %v122_v4 = vld [vmem:[%s374_s3 + $0x40] sm:$0xff]  ;;  %256 = vmatpush3.msra.mxu0 %v22_v0  ;;  %v119_v7 = vld [vmem:[%s374_s3 + $0x28] sm:$0xff]  ;;  %v117_v9 = vld [vmem:[%s374_s3 + $0x18] sm:$0xff] }
   0x4   :  { %260 = vmatprep.subr.mxu1 %v123_v3  ;;  %258 = vmatmul.mubr.msk.f32.vlgmr.msra.gmra.mxu0 %vm30_vm0, %v21_v2  ;;  %v118_v8 = vld [vmem:[%s374_s3 + $0x20] sm:$0xff]  ;;  %v116_v10 = vld [vmem:[%s374_s3 + $0x10] sm:$0xff]  ;;  %v115_v11 = vld [vmem:[%s374_s3 + $0x8] sm:$0xff] }
   0x5   :  { %261 = vmatpush3.msra.mxu1 %v123_v3  ;;  %v114_v12 = vld [vmem:[%s374_s3] sm:$0xff] }
   0x6   :  { %262 = vmatprep.subr.mxu1 %v122_v4  ;;  %v232_v13 = vld [vmem:[%s375_s2] ss:$0 sm:$0xff] }
   0x7   :  { %263 = vmatpush3.msra.mxu1 %v122_v4  ;;  %v235_v20 = vld [vmem:[%s376_s4] ss:$0 sm:$0xff] }
   0x8   :  { %264 = vmatprep.subr.mxu1 %v121_v5 }
   0x9   :  { %265 = vmatpush3.msra.mxu1 %v121_v5 }
   0xa   :  { %266 = vmatprep.subr.mxu1 %v120_v6 }
   0xb   :  { %267 = vmatpush3.msra.mxu1 %v120_v6 }
   0xc   :  { %268 = vmatprep.subr.mxu1 %v119_v7 }
   0xd   :  { %269 = vmatpush3.msra.mxu1 %v119_v7 }
   0xe   :  { %270 = vmatprep.subr.mxu1 %v118_v8 }
   0xf   :  { %271 = vmatpush3.msra.mxu1 %v118_v8 }
  0x10   :  { %272 = vmatprep.subr.mxu1 %v117_v9 }
  0x11   :  { %273 = vmatpush3.msra.mxu1 %v117_v9 }
  0x12   :  { %274 = vmatprep.subr.mxu1 %v116_v10 }
  0x13   :  { %275 = vmatpush3.msra.mxu1 %v116_v10 }
  0x14   :  { %276 = vmatprep.subr.mxu1 %v115_v11 }
  0x15   :  { %277 = vmatpush3.msra.mxu1 %v115_v11 }
  0x16   :  { %278 = vmatprep.subr.mxu1 %v114_v12 }
  0x17   :  { %279 = vmatpush3.msra.mxu1 %v114_v12 }
  0xc4   :  { %v259_v14 = vpop.f32.mrf.mxu0 }
  0xc5   :  { %v109_v15 = vadd.f32 %v259_v14, %v232_v13 }
  0xc6   :  { %v103_v16 = vpop.f32.mrf.mxu0 }
  0xc7   :  { %v104_v17 = vadd.f32 %v232_v13, %v103_v16  ;;  %v113_v19 = vmax.f32 %v109_v15, 0.0 }
  0xc9   :  { %v112_v18 = vmax.f32 %v104_v17, 0.0 }
  0xcb   :  { %280 = vmatprep.mubr.msk.f32.mxu1 %vm131_vm1, %v112_v18 }
  0xcc   :  { %281 = vmatmul.mubr.msk.f32.vlgmr.msra.gmra.mxu1 %vm131_vm1, %v113_v19 }
 0x18c   :  { %v282_v21 = vpop.f32.mrf.mxu1 }
 0x18d   :  { %v210_v22 = vadd.f32 %v282_v21, %v235_v20 }
 0x18e   :  { %v204_v23 = vpop.f32.mrf.mxu1 }
 0x18f   :  { %v239_v24 = vmul.f32 -1.442695, %v210_v22  ;;  %v205_v25 = vadd.f32 %v235_v20, %v204_v23 }
 0x191   :  { %283 = vpow2.f32 %v239_v24  ;;  %v238_v26 = vmul.f32 -1.442695, %v205_v25 }
 0x193   :  { %285 = vpow2.f32 %v238_v26 }
 0x19e   :  { %v284_v27 = vpop.eup %283 }
 0x19f   :  { %v220_v28 = vadd.f32 1.0, %v284_v27 }
 0x1a0   :  { %v286_v29 = vpop.eup %285 }
 0x1a1   :  { %287 = vrcp.f32 %v220_v28  ;;  %v219_v30 = vadd.f32 1.0, %v286_v29 }
 0x1a3   :  { %289 = vrcp.f32 %v219_v30 }
 0x1ae   :  { %v288_v31 = vpop.eup %287 }
 0x1af   :  { %227 = vst.msk [vmem:[%s377_s5 + $0x8] sm:$0xff] %vm225_vm2, %v288_v31 }
 0x1b0   :  { %v290_v32 = vpop.eup %289 }
 0x1b1   :  { %226 = vst.msk [vmem:[%s377_s5] sm:$0xff] %vm225_vm2, %v290_v32 }

</bundles_post_ra>
